<compile_context>
chip_gen: v5e
topology: v5e:2x2
jax: 0.10.0
libtpu: 0.0.40
codegen_flags: <defaults>
</compile_context>

<pallas_src>
import functools
import math

import jax
import jax.numpy as jnp
from jax.experimental import pallas as pl
from jax.experimental.pallas import tpu as pltpu


_VMEM_LIMIT_BYTES = 32 * 1024 * 1024     # raise v5e's 16 MiB default; within v7x's 64 MiB
_VMEM_TILE_BUDGET = 28 * 1024 * 1024     # headroom under the scoped limit
_TOKEN_TILE_CANDIDATES = (512, 384, 256, 128, 64, 32, 16, 8)


def _round_up(x, m):
    return ((x + m - 1) // m) * m


def _choose_token_tile(m, h, max_tile=512):
    """Largest MXU-friendly token tile that fits the VMEM budget.

    Prefers tiles that divide M (no padding) and give a grid of >= 2 steps so that
    v7x's two TensorCores both get work; otherwise pads M up to a tile multiple.
    Returns (tile, padded_M).
    """
    def fits(tm):
        x_bytes = 2 * tm * h * 4            # double-buffered f32 token tile
        o_bytes = 2 * tm * 4                # double-buffered (tm, 1) f32 output
        w_bytes = 2 * (2 * h * h * 2)       # double-buffered bf16 W1 + W2
        misc = 2 * (3 * h + 2) * 4          # biases + w3 row (f32)
        return x_bytes + o_bytes + w_bytes + misc <= _VMEM_TILE_BUDGET

    cands = [c for c in _TOKEN_TILE_CANDIDATES if c <= max_tile and fits(c)] or [8]
    divisors = [c for c in cands if m % c == 0]
    for c in divisors:
        if m // c >= 2:
            return c, m
    if divisors:
        return divisors[0], m
    rm = _round_up(m, 8)
    tm = next((c for c in cands if c <= rm), 8)
    return tm, _round_up(m, tm)


def _mlp_scorer_kernel(x_ref, w1_ref, b1_ref, w2_ref, b2_ref, w3_ref, b3_ref, ys_ref):
    """Linear -> ReLU -> Linear -> ReLU -> Linear(H->1) on a (TM, H) token tile.

    Matmuls run in bf16 on the MXU with f32 accumulation; the final H->1
    projection is a VPU multiply + lane reduce (overlaps under the MXU work).
    """
    x = x_ref[...].astype(jnp.bfloat16)                                     # (TM, H)
    h1 = jnp.dot(x, w1_ref[...], preferred_element_type=jnp.float32) + b1_ref[...]
    h1 = jnp.maximum(h1, 0.0).astype(jnp.bfloat16)
    h2 = jnp.dot(h1, w2_ref[...], preferred_element_type=jnp.float32) + b2_ref[...]
    h2 = jnp.maximum(h2, 0.0)                                               # (TM, H) f32
    logit = jnp.sum(h2 * w3_ref[...], axis=-1, keepdims=True) + b3_ref[...]  # (TM, 1)
    ys_ref[...] = logit                                                     # per-token score


def _select_k_kernel(q_ref, kcol_ref, out_ref, *, k):
    """select_k(y_soft, k, keep_first_unit=True) via per-tile rank counting.

    q_ref:    (1, 1, TQ)  query scores (lane-major row of this tile)
    kcol_ref: (1, S, 1)   full row of scores for this batch (sublane-major column)
    out_ref:  (1, 1, TQ)  int32 keep-mask (lane-dense store)

    keep_first_unit is folded in analytically: key j=0 is forced to the strict
    global minimum, so it contributes exactly +1 to every other rank and query 0
    always has rank 0.  Ties are broken by index (stable ascending sort).
    """
    tq = q_ref.shape[-1]
    s = kcol_ref.shape[1]
    q0 = pl.program_id(1) * tq

    yq = q_ref[0]                                                    # (1, TQ)
    yk = kcol_ref[0]                                                 # (S, 1)
    jk = jax.lax.broadcasted_iota(jnp.int32, (s, tq), 0)             # key index
    gq = q0 + jax.lax.broadcasted_iota(jnp.int32, (1, tq), 1)        # global query index

    smaller = (yk < yq) | ((yk == yq) & (jk < gq))                   # (S, TQ)
    smaller = smaller & (jk >= 1)                                    # key 0 handled below
    cnt = jnp.sum(smaller.astype(jnp.int32), axis=0, keepdims=True)  # (1, TQ)
    rank = jnp.where(gq == 0, 0, cnt + 1)                            # +1 for forced-min key 0
    out_ref[0] = (rank < k).astype(jnp.int32)


def init_params(key, hidden):
    """Deterministic init mimicking torch.nn.Linear's U(-1/sqrt(in), 1/sqrt(in))."""
    ks = jax.random.split(key, 6)
    s = 1.0 / math.sqrt(hidden)
    w1 = jax.random.uniform(ks[0], (hidden, hidden), jnp.float32, -s, s)
    b1 = jax.random.uniform(ks[1], (1, hidden), jnp.float32, -s, s)
    w2 = jax.random.uniform(ks[2], (hidden, hidden), jnp.float32, -s, s)
    b2 = jax.random.uniform(ks[3], (1, hidden), jnp.float32, -s, s)
    w3 = jax.random.uniform(ks[4], (1, hidden), jnp.float32, -s, s)   # torch layout (out, in)
    b3 = jax.random.uniform(ks[5], (1, 1), jnp.float32, -s, s)
    return (w1, b1, w2, b2, w3, b3)


def lstm_student_pruner(x, params, compression_rate, *, max_token_tile=512):
    """Returns (y_hard: bool (B,S), y_soft: f32 (B,S)) — same as the torch module."""
    B, S, H = x.shape
    k = max(int(S * (1.0 - compression_rate)), 1)
    w1, b1, w2, b2, w3, b3 = params
    w1b = w1.astype(jnp.bfloat16)
    w2b = w2.astype(jnp.bfloat16)

    # ---------------- kernel 1: the MLP scorer over (TM, H) token tiles --------------
    M = B * S
    xf = x.reshape(M, H)
    TM, Mp = _choose_token_tile(M, H, max_token_tile)
    if Mp != M:
        xf = jnp.pad(xf, ((0, Mp - M), (0, 0)))

    ys_col = pl.pallas_call(
        _mlp_scorer_kernel,
        out_shape=jax.ShapeDtypeStruct((Mp, 1), jnp.float32),
        grid=(Mp // TM,),
        in_specs=[
            pl.BlockSpec((TM, H), lambda i: (i, 0)),   # x tile (cast to bf16 in-kernel)
            pl.BlockSpec((H, H), lambda i: (0, 0)),    # W1 (bf16)
            pl.BlockSpec((1, H), lambda i: (0, 0)),    # b1 (f32)
            pl.BlockSpec((H, H), lambda i: (0, 0)),    # W2 (bf16)
            pl.BlockSpec((1, H), lambda i: (0, 0)),    # b2 (f32)
            pl.BlockSpec((1, H), lambda i: (0, 0)),    # w3 row (f32, VPU projection)
            pl.BlockSpec((1, 1), lambda i: (0, 0)),    # b3 (f32)
        ],
        out_specs=pl.BlockSpec((TM, 1), lambda i: (i, 0)),
        compiler_params=pltpu.CompilerParams(
            dimension_semantics=("parallel",),
            vmem_limit_bytes=_VMEM_LIMIT_BYTES),
    )(xf, w1b, b1, w2b, b2, w3, b3)

    y_soft = ys_col[:M, 0].reshape(B, S)

    # ---------------- kernel 2: select_k, tiled over (batch, query tiles) ------------
    TQ = 128 if (S % 128 == 0) else S
    yq_rows = y_soft.reshape(B, 1, S)     # queries: lane-major rows
    yk_cols = y_soft.reshape(B, S, 1)     # keys:    sublane-major column per batch

    y_hard_i32 = pl.pallas_call(
        functools.partial(_select_k_kernel, k=k),
        out_shape=jax.ShapeDtypeStruct((B, 1, S), jnp.int32),
        grid=(B, S // TQ),
        in_specs=[
            pl.BlockSpec((1, 1, TQ), lambda b, q: (b, 0, q)),
            pl.BlockSpec((1, S, 1), lambda b, q: (b, 0, 0)),
        ],
        out_specs=pl.BlockSpec((1, 1, TQ), lambda b, q: (b, 0, q)),
        compiler_params=pltpu.CompilerParams(
            dimension_semantics=("parallel", "arbitrary"),
            vmem_limit_bytes=_VMEM_LIMIT_BYTES),
    )(yq_rows, yk_cols)

    y_hard = y_hard_i32.reshape(B, S).astype(jnp.bool_)
    return y_hard, y_soft


if __name__ == "__main__":
    B, S, H = 2, 8, 32
    compression_rate = 0.5
    key = jax.random.PRNGKey(0)
    kx, kp = jax.random.split(key)
    x = jax.random.normal(kx, (B, S, H), jnp.float32)
    params = init_params(kp, H)

    y_hard, y_soft = lstm_student_pruner(x, params, compression_rate)
    y_hard, y_soft = jax.block_until_ready((y_hard, y_soft))

    # ---- structural checks (same semantics as the torch module) ----
    k = max(int(S * (1.0 - compression_rate)), 1)
    assert y_soft.shape == (B, S) and y_soft.dtype == jnp.float32
    assert y_hard.shape == (B, S) and y_hard.dtype == jnp.bool_
    assert bool(jnp.all(jnp.sum(y_hard, axis=1) == k))      # exactly k tokens kept per row
    assert bool(jnp.all(y_hard[:, 0]))                      # first token always kept

    # ---- MLP reference (same bf16/f32 precision as the kernel) ----
    w1, b1, w2, b2, w3, b3 = params
    xb = x.reshape(-1, H).astype(jnp.bfloat16)
    h1 = jnp.maximum(jnp.dot(xb, w1.astype(jnp.bfloat16),
                             preferred_element_type=jnp.float32) + b1, 0.0)
    h2 = jnp.maximum(jnp.dot(h1.astype(jnp.bfloat16), w2.astype(jnp.bfloat16),
                             preferred_element_type=jnp.float32) + b2, 0.0)
    y_ref = (jnp.sum(h2 * w3, axis=-1) + b3[0, 0]).reshape(B, S)
    assert bool(jnp.allclose(y_soft, y_ref, atol=1e-2, rtol=1e-2))

    # ---- select_k reference (double argsort, as in the torch code) ----
    y_mod = y_soft.at[:, 0].set(jnp.min(y_soft) - 1.0)
    ranks = jnp.argsort(jnp.argsort(y_mod, axis=1), axis=1)
    assert bool(jnp.all(y_hard == (ranks < k)))

    print("KERNEL_OK")
</pallas_src>

<mosaic_0001>
module attributes {stable_mosaic.version = 11 : i64} {
  func.func @_mlp_scorer_kernel(%arg0: i32, %arg1: memref<8x32xf32, #tpu.memory_space<vmem>>, %arg2: memref<32x32xbf16, #tpu.memory_space<vmem>>, %arg3: memref<1x32xf32, #tpu.memory_space<vmem>>, %arg4: memref<32x32xbf16, #tpu.memory_space<vmem>>, %arg5: memref<1x32xf32, #tpu.memory_space<vmem>>, %arg6: memref<1x32xf32, #tpu.memory_space<vmem>>, %arg7: memref<1x1xf32, #tpu.memory_space<vmem>>, %arg8: memref<8x1xf32, #tpu.memory_space<vmem>>) attributes {dimension_semantics = [#tpu.dimension_semantics<parallel>], iteration_bounds = array<i64: 2>, scalar_prefetch = 0 : i64, scratch_operands = 0 : i64, tpu.core_type = #tpu.core_type<tc>, window_params = [{transform_indices = @transform_0, window_bounds = array<i64: 8, 32>}, {pipeline_mode = #tpu.pipeline_mode<synchronous>, transform_indices = @transform_1, window_bounds = array<i64: 32, 32>}, {pipeline_mode = #tpu.pipeline_mode<synchronous>, transform_indices = @transform_2, window_bounds = array<i64: 1, 32>}, {pipeline_mode = #tpu.pipeline_mode<synchronous>, transform_indices = @transform_3, window_bounds = array<i64: 32, 32>}, {pipeline_mode = #tpu.pipeline_mode<synchronous>, transform_indices = @transform_4, window_bounds = array<i64: 1, 32>}, {pipeline_mode = #tpu.pipeline_mode<synchronous>, transform_indices = @transform_5, window_bounds = array<i64: 1, 32>}, {pipeline_mode = #tpu.pipeline_mode<synchronous>, transform_indices = @transform_6, window_bounds = array<i64: 1, 1>}, {transform_indices = @transform_7, window_bounds = array<i64: 8, 1>}]} {
    %c0 = arith.constant 0 : index
    %c0_0 = arith.constant 0 : index
    %0 = vector.load %arg1[%c0, %c0_0] : memref<8x32xf32, #tpu.memory_space<vmem>>, vector<8x32xf32>
    %1 = arith.truncf %0 : vector<8x32xf32> to vector<8x32xbf16>
    %c0_1 = arith.constant 0 : index
    %c0_2 = arith.constant 0 : index
    %2 = vector.load %arg2[%c0_1, %c0_2] : memref<32x32xbf16, #tpu.memory_space<vmem>>, vector<32x32xbf16>
    %cst = arith.constant dense<0.000000e+00> : vector<8x32xf32>
    %3 = tpu.matmul %1, %2, %cst {dimension_numbers = #tpu.dot_dimension_numbers<[1], [0], [0], [1], [0, 0, 1, 1], [], []>} : vector<8x32xbf16>, vector<32x32xbf16>, vector<8x32xf32> -> vector<8x32xf32>
    %c0_3 = arith.constant 0 : index
    %c0_4 = arith.constant 0 : index
    %4 = vector.load %arg3[%c0_3, %c0_4] : memref<1x32xf32, #tpu.memory_space<vmem>>, vector<1x32xf32>
    %5 = vector.broadcast %4 : vector<1x32xf32> to vector<8x32xf32>
    %6 = arith.addf %3, %5 : vector<8x32xf32>
    %cst_5 = arith.constant 0.000000e+00 : f32
    %7 = vector.broadcast %cst_5 : f32 to vector<8x32xf32>
    %8 = arith.maximumf %6, %7 : vector<8x32xf32>
    %9 = arith.truncf %8 : vector<8x32xf32> to vector<8x32xbf16>
    %c0_6 = arith.constant 0 : index
    %c0_7 = arith.constant 0 : index
    %10 = vector.load %arg4[%c0_6, %c0_7] : memref<32x32xbf16, #tpu.memory_space<vmem>>, vector<32x32xbf16>
    %cst_8 = arith.constant dense<0.000000e+00> : vector<8x32xf32>
    %11 = tpu.matmul %9, %10, %cst_8 {dimension_numbers = #tpu.dot_dimension_numbers<[1], [0], [0], [1], [0, 0, 1, 1], [], []>} : vector<8x32xbf16>, vector<32x32xbf16>, vector<8x32xf32> -> vector<8x32xf32>
    %c0_9 = arith.constant 0 : index
    %c0_10 = arith.constant 0 : index
    %12 = vector.load %arg5[%c0_9, %c0_10] : memref<1x32xf32, #tpu.memory_space<vmem>>, vector<1x32xf32>
    %13 = vector.broadcast %12 : vector<1x32xf32> to vector<8x32xf32>
    %14 = arith.addf %11, %13 : vector<8x32xf32>
    %cst_11 = arith.constant 0.000000e+00 : f32
    %15 = vector.broadcast %cst_11 : f32 to vector<8x32xf32>
    %16 = arith.maximumf %14, %15 : vector<8x32xf32>
    %c0_12 = arith.constant 0 : index
    %c0_13 = arith.constant 0 : index
    %17 = vector.load %arg6[%c0_12, %c0_13] : memref<1x32xf32, #tpu.memory_space<vmem>>, vector<1x32xf32>
    %18 = vector.broadcast %17 : vector<1x32xf32> to vector<8x32xf32>
    %19 = arith.mulf %16, %18 : vector<8x32xf32>
    %cst_14 = arith.constant dense<0.000000e+00> : vector<8xf32>
    %20 = vector.multi_reduction <add>, %19, %cst_14 [1] : vector<8x32xf32> to vector<8xf32>
    %21 = vector.shape_cast %20 : vector<8xf32> to vector<8x1xf32>
    %c0_15 = arith.constant 0 : index
    %c0_16 = arith.constant 0 : index
    %22 = vector.load %arg7[%c0_15, %c0_16] : memref<1x1xf32, #tpu.memory_space<vmem>>, vector<1x1xf32>
    %23 = vector.broadcast %22 : vector<1x1xf32> to vector<8x1xf32>
    %24 = arith.addf %21, %23 : vector<8x1xf32>
    %c0_17 = arith.constant 0 : index
    %c0_18 = arith.constant 0 : index
    %25 = vector.load %arg8[%c0_17, %c0_18] : memref<8x1xf32, #tpu.memory_space<vmem>>, vector<8x1xf32>
    tpu.vector_store %arg8[%c0_17, %c0_18], %24 {strides = array<i32>} : memref<8x1xf32, #tpu.memory_space<vmem>>, vector<8x1xf32>,
    return
  }
  func.func @transform_0(%arg0: i32) -> (i32, i32) {
    %c0_i32 = arith.constant 0 : i32
    %c0_i32_0 = arith.constant 0 : i32
    return %arg0, %c0_i32 : i32, i32
  }
  func.func @transform_1(%arg0: i32) -> (i32, i32) {
    %c0_i32 = arith.constant 0 : i32
    %c0_i32_0 = arith.constant 0 : i32
    %c0_i32_1 = arith.constant 0 : i32
    return %c0_i32, %c0_i32_0 : i32, i32
  }
  func.func @transform_2(%arg0: i32) -> (i32, i32) {
    %c0_i32 = arith.constant 0 : i32
    %c0_i32_0 = arith.constant 0 : i32
    %c0_i32_1 = arith.constant 0 : i32
    return %c0_i32, %c0_i32_0 : i32, i32
  }
  func.func @transform_3(%arg0: i32) -> (i32, i32) {
    %c0_i32 = arith.constant 0 : i32
    %c0_i32_0 = arith.constant 0 : i32
    %c0_i32_1 = arith.constant 0 : i32
    return %c0_i32, %c0_i32_0 : i32, i32
  }
  func.func @transform_4(%arg0: i32) -> (i32, i32) {
    %c0_i32 = arith.constant 0 : i32
    %c0_i32_0 = arith.constant 0 : i32
    %c0_i32_1 = arith.constant 0 : i32
    return %c0_i32, %c0_i32_0 : i32, i32
  }
  func.func @transform_5(%arg0: i32) -> (i32, i32) {
    %c0_i32 = arith.constant 0 : i32
    %c0_i32_0 = arith.constant 0 : i32
    %c0_i32_1 = arith.constant 0 : i32
    return %c0_i32, %c0_i32_0 : i32, i32
  }
  func.func @transform_6(%arg0: i32) -> (i32, i32) {
    %c0_i32 = arith.constant 0 : i32
    %c0_i32_0 = arith.constant 0 : i32
    %c0_i32_1 = arith.constant 0 : i32
    return %c0_i32, %c0_i32_0 : i32, i32
  }
  func.func @transform_7(%arg0: i32) -> (i32, i32) {
    %c0_i32 = arith.constant 0 : i32
    %c0_i32_0 = arith.constant 0 : i32
    return %arg0, %c0_i32 : i32, i32
  }
}

</mosaic_0001>

<bundles_post_ra>
// kernel: tpu_custom_call.1
= control target key start
LH: loop header
LB: loop body
LE: loop exit
PB: predicated region body
PF: predicated region fallthrough
CT: control target
= control target key end

     0   :  { %s909_s0 = inlined_call_operand.hbm [shape: f32[16,32], index: 0, kind: input, shape index: {}]   ;;  %s910_s1 = inlined_call_operand.hbm [shape: bf16[32,32], index: 1, kind: input, shape index: {}]   ;;  %s911_s2 = inlined_call_operand.vmem [shape: f32[1,32], index: 2, kind: input, shape index: {}]   ;;  %s912_s3 = inlined_call_operand.hbm [shape: bf16[32,32], index: 3, kind: input, shape index: {}]   ;;  %s913_s4 = inlined_call_operand.vmem [shape: f32[1,32], index: 4, kind: input, shape index: {}]   ;;  %s914_s5 = inlined_call_operand.vmem [shape: f32[1,32], index: 5, kind: input, shape index: {}]   ;;  %s915_s6 = inlined_call_operand.<no memory space> [shape: f32[1,1], index: 6, kind: input, shape index: {}]   ;;  %s916_s7 = inlined_call_operand.vmem [shape: f32[16,1], index: 7, kind: output, shape index: {}]  }
   0x1   :  { %v12_v0 = vstv %s915_s6 }
   0x2   :  { %13 = vst [vmem:[#allocation2] sm:$0x1] %v12_v0 }
   0x3   :  { %14 = vsyncpa [#allocation4], 0 }
   0x4   :  { %16 = vsyncpa [#allocation4 + $0x1], 0 }
   0x5   :  { %17 = vsyncpa [#allocation6], 0  ;;  %s788_s26 = smov 0   ;;  %s790_s27 = smov 0  }
   0x6   :  { %s792_s28 = smov 0   ;;  %s794_s29 = smov 0  }
   0x7 LB: > { %s217_s8 = sshll.u32 %s910_s1, 4  ;;  %s812_s9 = sadd.s32 4294967295, %s739_s29   ;;  %s739_s29 = sphi %s794_s29, %s923_s29   ;;  %s735_s28 = sphi %s792_s28, %s922_s28   ;;  %s731_s27 = sphi %s790_s27, %s921_s27   ;;  %s727_s26 = sphi %s788_s26, %s920_s26   ;;  %s218_s8 = int_to_ptr.hbm [resolvable:$true] %s217_s8 }
   0x8   : > { %p510_p0 = scmp.ge.s32.totalorder %s739_s29, 1  ;;  %p44_p1 = scmp.eq.s32.totalorder %s812_s9, 0 }
   0x9   : > { %p206_p2 = scmp.lt.s32.totalorder %s739_s29, 3  ;;  %s741_s11 = smov [#allocation5]  }
   0xa   : > { %s219_s12 = sshll.u32 %s741_s11, 4  ;;  %s234_s15 = sshll.u32 %s912_s3, 4  ;;  %s220_s12 = int_to_ptr.vmem [resolvable:$true] %s219_s12  ;;  %s235_s15 = int_to_ptr.hbm [resolvable:$true] %s234_s15 }
   0xb   : > { %p817_p3 = pnand %p510_p0, %p206_p2  ;;  %s742_s16 = smov [#allocation7]  }
   0xc   : > { %s236_s17 = sshll.u32 %s742_s16, 4  ;;  %s743_s18 = smov 64   ;;  %s237_s17 = int_to_ptr.vmem [resolvable:$true] %s236_s17 }
   0xd   : > { %p555_p4 = pneg %p817_p3  ;;  %s744_s19 = smov 4  }
   0xe   : > { %s829_s20 = sadd.s32 1, %s739_s29   ;;  %s30_s22 = sadd.s32 1, %s735_s28 }
   0xf   : > { %p556_p5 = pnand %p555_p4, %p44_p1  ;;  %s27_s21 = ssub.s32 %s739_s29, %s829_s20 }
  0x10   : > { %p28_p6 = scmp.eq.s32.totalorder %s27_s21, 0  ;;  %p37_p7 = scmp.ne.s32.totalorder %s735_s28, %s731_s27 }
  0x11   : > { %558 = dma.hbm_to_vmem [thread:$0]  (!%p556_p5), %s218_s8, 256, %s220_s12, [#allocation6], %s743_s18, %s743_s18, %s744_s19  }
  0x12   : > { %561 = dma.hbm_to_vmem [thread:$0]  (!%p556_p5), %s235_s15, 256, %s237_s17, [#allocation6], %s743_s18, %s743_s18, %s744_s19  }
  0x13   : > { %p38_p8 = scmp.eq.s32.totalorder %s739_s29, 0  ;;  %p43_p9 = scmp.ne.s32.totalorder %s731_s27, %s727_s26 }
  0x14   : > { %s840_s23 = scalar_select %p28_p6, %s735_s28, %s30_s22  }
  0x15   : > { %p844_p10 = por %p44_p1, %p43_p9  ;;  %p568_p11 = scmp.lt.s32.totalorder %s739_s29, 2 }
  0x16   : > { %s259_s25 = sand.u32 1, %s735_s28   ;;  %s515_s6 = sshll.u32 %s739_s29, 3 }
  0x17   : > { %p39_p12 = por %p38_p8, %p37_p7  ;;  %s514_s30 = sshll.u32 %s259_s25, 3 }
  0x18   : > { %s267_s12 = scalar_lea.hbm %s909_s0, %s515_s6  ;;  %s263_s14 = scalar_lea.vmem [#allocation3], %s514_s30 }
  0x19   : > { %s269_s13 = sshll.u32 %s267_s12, 4  ;;  %s271_s15 = sshll.u32 %s263_s14, 4  ;;  %s270_s13 = int_to_ptr.hbm [resolvable:$true] %s269_s13  ;;  %s272_s15 = int_to_ptr.vmem [resolvable:$true] %s271_s15 }
  0x1a   : > { %p854_p13 = pnand %p568_p11, %p39_p12  ;;  %s260_s16 = scalar_lea.sflag [#allocation4], %s259_s25 }
  0x1b   : > { %s671_s17 = sshra.s32 %s270_s13, 4  ;;  %s678_s21 = scalar_lea.hbm %s909_s0, 16  ;;  %s672_s17 = int_to_ptr.hbm [resolvable:$true] %s671_s17 }
  0x1c   : > { %s673_s29 = scalar_lea.hbm %s672_s17, 8  ;;  %p675_p2 = pneg %p854_p13 }
  0x1d   : > { %p674_p0 = scmp.ne.s32.totalorder %s672_s17, %s673_s29  ;;  %p679_p6 = scmp.lt.s32.totalorder %s672_s17, %s909_s0 }
  0x1e   : > { %p680_p7 = scmp.lt.s32.totalorder %s678_s21, %s673_s29 }
  0x1f   : > { %p676_p4 = pnand %p675_p2, %p674_p0 }
  0x20   : > { %p681_p8 = por %p680_p7, %p679_p6 }
  0x21   : > { %p677_p5 = pneg %p676_p4 }
  0x23   : > { %p682_p9 = pnand %p681_p8, %p677_p5 }
  0x25   : > { %685 = shalt.err (!%p682_p9)
}
  0x26   : > { %565 = dma.hbm_to_vmem [thread:$0]  (!%p854_p13), %s270_s13, 128, %s272_s15, %s260_s16  }
  0x27   : > { %280 = sbr.rel (%p817_p3) target bundleno = 439 (0x1b7), region = 48  ;;  %s282_s25 = sand.u32 (!%p817_p3), 1, %s731_s27  }
  0x28   : > { %s517_s30 = sshll.u32 (!%p817_p3), %s282_s25, 3  ;;  %s283_s8 = scalar_lea.sflag (!%p817_p3), [#allocation4], %s282_s25 }
  0x29   : > { %s286_s11 = scalar_lea.vmem (!%p817_p3), [#allocation3], %s517_s30 }
  0x2c   : > { %718 = dma.done.wait (%p844_p10), %s283_s8, 128  }
  0x2d   : > { %720 = vsyncadd (%p844_p10), %s283_s8, 4294967168 }
  0x2e   : > { %722 = dma.done.wait (%p44_p1), [#allocation6], 512  }
  0x2f   : > { %724 = vsyncadd (%p44_p1), [#allocation6], 4294966784  ;;  %v542_v1 = vld [vmem:[#allocation5 + $0x8] sm:$0xff]  ;;  %v541_v2 = vld [vmem:[#allocation5] sm:$0xff]  ;;  %vm354_vm0 = vcmask 261120   ;;  %p327_p1 = scmp.lt.s32.totalorder %s812_s9, 1 }
  0x30   : > { %364 = vmatpush.bf16.msra.mxu0 %v542_v1  ;;  %v332_v3 = vld [vmem:[%s286_s11] sm:$0xff]  ;;  %v607_v7 = vld [vmem:[%s911_s2] ss:$0 sm:$0xff]  ;;  %vm423_vm1 = vcmask 7168  }
  0x31   : > { %v333_v4 = vpack.c.bf16 %v332_v3, %v332_v3  ;;  %v544_v5 = vld [vmem:[#allocation7 + $0x8] sm:$0xff]  ;;  %v543_v6 = vld [vmem:[#allocation7] sm:$0xff]  ;;  %v608_v13 = vld [vmem:[%s913_s4] ss:$0 sm:$0xff]  ;;  %s925_s9 = smov (!%p327_p1, %s812_s9), 1 }
  0x32   : > { %402 = vmatpush.bf16.msra.mxu1 %v544_v5  ;;  %v609_v16 = vld [vmem:[%s914_s5] ss:$0 sm:$0xff]  ;;  %s520_s26 = sshll.u32 %s925_s9, 3 }
  0x33   : > { %v610_v21 = vld [vmem:[#allocation2] ss:$0 sm:$0xff]  ;;  %s330_s29 = scalar_lea.vmem %s916_s7, %s520_s26 }
  0x34   : > { %365 = vmatpush.bf16.msra.mxu0 %v541_v2 }
  0x36   : > { %403 = vmatpush.bf16.msra.mxu1 %v543_v6 }
  0x37   : > { %529 = vmatmul.msk.bf16.vlgmr.msra.gmra.mxu0 %vm354_vm0, %v333_v4 }
  0xb4   : > { %v367_v8 = vpop.f32.mrf.mxu0 }
  0xb5   : > { %v368_v9 = vadd.f32 %v607_v7, %v367_v8 }
  0xb7   : > { %v371_v10 = vmax.f32 %v368_v9, 0.0 }
  0xb9   : > { %v372_v11 = vpack.c.bf16 %v371_v10, %v371_v10 }
  0xbb   : > { %538 = vmatmul.msk.bf16.vlgmr.msra.gmra.mxu1 %vm354_vm0, %v372_v11 }
  0xbc   : > { %v369_v12 = vpop.f32.mrf.mxu0 }
 0x138   : > { %v405_v14 = vpop.f32.mrf.mxu1 }
 0x139   : > { %v406_v15 = vadd.f32 %v608_v13, %v405_v14 }
 0x13b   : > { %v409_v17 = vmax.f32 %v406_v15, 0.0 }
 0x13d   : > { %v414_v18 = vmul.f32 %v609_v16, %v409_v17 }
 0x13f   : > { %v415_v19 = vsel %vm354_vm0, %v414_v18, 0.0 }
 0x140   : > { %v407_v20 = vpop.f32.mrf.mxu1  ;;  %416 = vadd.xlane.f32.xlu0 %v415_v19 }
 0x1b3   : > { %v417_v22 = vpop.xlane.xlu0 %416 }
 0x1b4   : > { %v422_v23 = vadd.f32 %v610_v21, %v417_v22 }
 0x1b6   : > { %424 = vst.msk [vmem:[%s330_s29] sm:$0xff] %vm423_vm1, %v422_v23 }
 0x1b7 PF: > { %p20_p3 = scmp.ge.s32.totalorder %s829_s20, 4   ;;  %s920_s26 = smov %s731_s27 }
 0x1b8   : > { %s921_s27 = smov %s735_s28  ;;  %s922_s28 = smov %s840_s23 }
 0x1b9   : > { %s923_s29 = smov %s829_s20  ;;  %22 = sbr.rel (!%p20_p3) target bundleno = 7 (0x7), region = 96 }
 0x1be   :  { %444 = vsyncpa [#allocation4], 1 }
 0x1bf   :  { %446 = vsyncpa [#allocation4 + $0x1], 1 }
 0x1c0   :  { %447 = vsyncpa [#allocation6], 1 }

</bundles_post_ra>
